<compile_context>
chip_gen: v7x
topology: tpu7x:2x2x1
jax: 0.10.0
libtpu: 0.0.40
codegen_flags: <defaults>
</compile_context>

<pallas_src>
from functools import partial

import jax
import jax.numpy as jnp
from jax import lax
from jax.experimental import pallas as pl
from jax.experimental.pallas import tpu as pltpu


def fca_kernel(x_ref, w1_ref, w2_ref, o_ref, *, inv_hw):
    # x_ref / o_ref: (TB, C, HW);  w1_ref: (hidden, C);  w2_ref: (C, hidden)

    # ---- squeeze: global average pool over the spatial (lane) axis ---------
    # HW is the logical last dim; VMEM lane padding lies outside the logical
    # array, so a plain sum * 1/(H*W) is an exact mean.  Accumulate in f32.
    pooled = jnp.sum(x_ref[...].astype(jnp.float32), axis=-1) * inv_hw  # (TB, C)

    # ---- excite (batched over TB): Linear -> ReLU6 -> Linear -> Sigmoid ----
    w1 = w1_ref[...].astype(jnp.float32)                                # (hid, C)
    w2 = w2_ref[...].astype(jnp.float32)                                # (C, hid)
    h = lax.dot_general(pooled, w1, (((1,), (1,)), ((), ())),
                        preferred_element_type=jnp.float32)             # (TB, hid)
    h = jnp.clip(h, 0.0, 6.0)                                           # ReLU6
    s = lax.dot_general(h, w2, (((1,), (1,)), ((), ())),
                        preferred_element_type=jnp.float32)             # (TB, C)
    gate = jax.nn.sigmoid(s).astype(o_ref.dtype)                        # (TB, C)

    # ---- scale: re-read x from VMEM; (TB,C,1) gate broadcasts along lanes --
    o_ref[...] = (x_ref[...] * gate[:, :, None]).astype(o_ref.dtype)


def _pick_batch_tile(B, per_batch_bytes, max_block_bytes=2 * 1024 * 1024,
                     target_grid=8):
    """Pick the batch tile TB (a divisor of B).

    Priorities (highest first):
      1. block fits the VMEM budget (<= max_block_bytes; ~4x that resident
         with double-buffered in+out blocks, safe on v7x's 64 MiB VMEM),
      2. grid depth >= min(target_grid, B) so the double-buffered pipeline
         reaches steady state (>= ~4 steps per TensorCore on v7x),
      3. even grid length (equal work on v7x's two TensorCores),
      4. largest TB (bigger blocks amortize the ~0.35us per-step overhead).
    """
    cap = max(1, max_block_bytes // max(per_batch_bytes, 1))
    cap = min(cap, B)
    divisors = [d for d in range(1, B + 1) if B % d == 0]
    candidates = [d for d in divisors if d <= cap] or [1]
    min_grid = min(target_grid, B)

    def score(tb):
        grid = B // tb
        deep = grid >= min_grid
        even = (grid % 2 == 0) or grid == 1
        return (deep, even, tb)

    return max(candidates, key=score)


def fca_forward(x, w1, w2):
    """x: (B, C, H, W); w1: (hidden, C); w2: (C, hidden) (torch Linear layout)."""
    B, C, H, W = x.shape
    hidden = w1.shape[0]
    HW = H * W

    # No HBM-side spatial padding: the block's last two dims equal the full
    # array dims, which exempts them from the (8,128) divisibility rule.
    x_flat = x.reshape(B, C, HW)

    itemsize = jnp.dtype(x.dtype).itemsize
    TB = _pick_batch_tile(B, C * HW * itemsize)
    grid = (B // TB,)

    kernel = partial(fca_kernel, inv_hw=1.0 / HW)

    out_flat = pl.pallas_call(
        kernel,
        out_shape=jax.ShapeDtypeStruct((B, C, HW), x.dtype),
        grid_spec=pltpu.PrefetchScalarGridSpec(
            num_scalar_prefetch=0,
            grid=grid,
            in_specs=[
                pl.BlockSpec((TB, C, HW), lambda b: (b, 0, 0)),
                pl.BlockSpec((hidden, C), lambda b: (0, 0)),
                pl.BlockSpec((C, hidden), lambda b: (0, 0)),
            ],
            out_specs=pl.BlockSpec((TB, C, HW), lambda b: (b, 0, 0)),
        ),
        compiler_params=pltpu.CompilerParams(
            dimension_semantics=("parallel",),
            vmem_limit_bytes=32 * 1024 * 1024,   # safe on v5e/v6e/v7x
        ),
    )(x_flat, w1, w2)

    return out_flat.reshape(B, C, H, W)


def fca_reference(x, w1, w2):
    """Pure-JAX reference matching the PyTorch forward (torch weight layout)."""
    xf = x.astype(jnp.float32)
    pooled = jnp.mean(xf, axis=(2, 3))                    # AdaptiveAvgPool2d(1)
    h = jnp.clip(pooled @ w1.astype(jnp.float32).T, 0.0, 6.0)   # Linear + ReLU6
    s = jax.nn.sigmoid(h @ w2.astype(jnp.float32).T)            # Linear + Sigmoid
    return xf * s[:, :, None, None]


if __name__ == "__main__":
    key = jax.random.PRNGKey(0)
    keys = jax.random.split(key, 9)

    # Case 1: small aligned case, FCA(channels=32, reduction_ratio=4), B=2.
    B, C, H, W = 2, 32, 16, 16
    hid = C // 4
    x1 = jax.random.normal(keys[0], (B, C, H, W), dtype=jnp.float32)
    w1a = jax.random.normal(keys[1], (hid, C), dtype=jnp.float32) * 0.1  # torch layout
    w2a = jax.random.normal(keys[2], (C, hid), dtype=jnp.float32) * 0.1
    out1 = jax.block_until_ready(fca_forward(x1, w1a, w2a))
    ref1 = fca_reference(x1, w1a, w2a)
    assert out1.shape == x1.shape
    assert jnp.allclose(out1, ref1, atol=1e-5, rtol=1e-5)

    # Case 2: unaligned spatial (7x7, HW=49 lanes, no HBM padding), C=64, B=4.
    B, C, H, W = 4, 64, 7, 7
    hid = C // 4
    x2 = jax.random.normal(keys[3], (B, C, H, W), dtype=jnp.float32)
    w1b = jax.random.normal(keys[4], (hid, C), dtype=jnp.float32) * 0.1
    w2b = jax.random.normal(keys[5], (C, hid), dtype=jnp.float32) * 0.1
    out2 = jax.block_until_ready(fca_forward(x2, w1b, w2b))
    ref2 = fca_reference(x2, w1b, w2b)
    assert out2.shape == x2.shape
    assert jnp.allclose(out2, ref2, atol=1e-5, rtol=1e-5)

    # Case 3: bf16 data path (x / output stay bf16 end-to-end), C=64, B=4.
    B, C, H, W = 4, 64, 16, 16
    hid = C // 4
    x3 = jax.random.normal(keys[6], (B, C, H, W), dtype=jnp.float32).astype(jnp.bfloat16)
    w1c = jax.random.normal(keys[7], (hid, C), dtype=jnp.float32) * 0.1
    w2c = jax.random.normal(keys[8], (C, hid), dtype=jnp.float32) * 0.1
    out3 = jax.block_until_ready(fca_forward(x3, w1c, w2c))
    ref3 = fca_reference(x3, w1c, w2c)
    assert out3.shape == x3.shape
    assert out3.dtype == jnp.bfloat16
    assert jnp.allclose(out3.astype(jnp.float32), ref3, atol=5e-2, rtol=5e-2)

    print("KERNEL_OK")
</pallas_src>

<mosaic_0001>
module attributes {stable_mosaic.version = 11 : i64} {
  func.func @fca_kernel(%arg0: i32, %arg1: memref<1x32x256xf32, #tpu.memory_space<vmem>>, %arg2: memref<8x32xf32, #tpu.memory_space<vmem>>, %arg3: memref<32x8xf32, #tpu.memory_space<vmem>>, %arg4: memref<1x32x256xf32, #tpu.memory_space<vmem>>) attributes {dimension_semantics = [#tpu.dimension_semantics<parallel>], iteration_bounds = array<i64: 2>, scalar_prefetch = 0 : i64, scratch_operands = 0 : i64, tpu.core_type = #tpu.core_type<tc>, window_params = [{transform_indices = @transform_0, window_bounds = array<i64: 1, 32, 256>}, {pipeline_mode = #tpu.pipeline_mode<synchronous>, transform_indices = @transform_1, window_bounds = array<i64: 8, 32>}, {pipeline_mode = #tpu.pipeline_mode<synchronous>, transform_indices = @transform_2, window_bounds = array<i64: 32, 8>}, {transform_indices = @transform_3, window_bounds = array<i64: 1, 32, 256>}]} {
    %c0 = arith.constant 0 : index
    %c0_0 = arith.constant 0 : index
    %c0_1 = arith.constant 0 : index
    %0 = vector.load %arg1[%c0, %c0_0, %c0_1] : memref<1x32x256xf32, #tpu.memory_space<vmem>>, vector<1x32x256xf32>
    %cst = arith.constant dense<0.000000e+00> : vector<1x32xf32>
    %1 = vector.multi_reduction <add>, %0, %cst [2] : vector<1x32x256xf32> to vector<1x32xf32>
    %cst_2 = arith.constant 3.906250e-03 : f32
    %2 = vector.broadcast %cst_2 : f32 to vector<1x32xf32>
    %3 = arith.mulf %1, %2 : vector<1x32xf32>
    %c0_3 = arith.constant 0 : index
    %c0_4 = arith.constant 0 : index
    %4 = vector.load %arg2[%c0_3, %c0_4] : memref<8x32xf32, #tpu.memory_space<vmem>>, vector<8x32xf32>
    %c0_5 = arith.constant 0 : index
    %c0_6 = arith.constant 0 : index
    %5 = vector.load %arg3[%c0_5, %c0_6] : memref<32x8xf32, #tpu.memory_space<vmem>>, vector<32x8xf32>
    %cst_7 = arith.constant dense<0.000000e+00> : vector<1x8xf32>
    %6 = tpu.matmul %3, %4, %cst_7 {dimension_numbers = #tpu.dot_dimension_numbers<[1], [1], [0], [0], [0, 0, 1, 0], [], []>} : vector<1x32xf32>, vector<8x32xf32>, vector<1x8xf32> -> vector<1x8xf32>
    %cst_8 = arith.constant 0.000000e+00 : f32
    %cst_9 = arith.constant 6.000000e+00 : f32
    %7 = vector.broadcast %cst_8 : f32 to vector<1x8xf32>
    %8 = arith.maximumf %7, %6 : vector<1x8xf32>
    %9 = vector.broadcast %cst_9 : f32 to vector<1x8xf32>
    %10 = arith.minimumf %9, %8 : vector<1x8xf32>
    %cst_10 = arith.constant dense<0.000000e+00> : vector<1x32xf32>
    %11 = tpu.matmul %10, %5, %cst_10 {dimension_numbers = #tpu.dot_dimension_numbers<[1], [1], [0], [0], [0, 0, 1, 0], [], []>} : vector<1x8xf32>, vector<32x8xf32>, vector<1x32xf32> -> vector<1x32xf32>
    %12 = arith.negf %11 : vector<1x32xf32>
    %13 = math.exp %12 : vector<1x32xf32>
    %cst_11 = arith.constant 1.000000e+00 : f32
    %14 = vector.broadcast %cst_11 : f32 to vector<1x32xf32>
    %15 = arith.addf %14, %13 : vector<1x32xf32>
    %16 = arith.divf %14, %15 : vector<1x32xf32>
    %c0_12 = arith.constant 0 : index
    %c0_13 = arith.constant 0 : index
    %c0_14 = arith.constant 0 : index
    %17 = vector.load %arg1[%c0_12, %c0_13, %c0_14] : memref<1x32x256xf32, #tpu.memory_space<vmem>>, vector<1x32x256xf32>
    %18 = vector.shape_cast %16 : vector<1x32xf32> to vector<1x32x1xf32>
    %19 = vector.broadcast %18 : vector<1x32x1xf32> to vector<1x32x256xf32>
    %20 = arith.mulf %17, %19 : vector<1x32x256xf32>
    %c0_15 = arith.constant 0 : index
    %c0_16 = arith.constant 0 : index
    %c0_17 = arith.constant 0 : index
    %21 = vector.load %arg4[%c0_15, %c0_16, %c0_17] : memref<1x32x256xf32, #tpu.memory_space<vmem>>, vector<1x32x256xf32>
    tpu.vector_store %arg4[%c0_15, %c0_16, %c0_17], %20 {strides = array<i32>} : memref<1x32x256xf32, #tpu.memory_space<vmem>>, vector<1x32x256xf32>,
    return
  }
  func.func @transform_0(%arg0: i32) -> (i32, i32, i32) {
    %c0_i32 = arith.constant 0 : i32
    %c0_i32_0 = arith.constant 0 : i32
    %c0_i32_1 = arith.constant 0 : i32
    return %arg0, %c0_i32, %c0_i32_0 : i32, i32, i32
  }
  func.func @transform_1(%arg0: i32) -> (i32, i32) {
    %c0_i32 = arith.constant 0 : i32
    %c0_i32_0 = arith.constant 0 : i32
    %c0_i32_1 = arith.constant 0 : i32
    return %c0_i32, %c0_i32_0 : i32, i32
  }
  func.func @transform_2(%arg0: i32) -> (i32, i32) {
    %c0_i32 = arith.constant 0 : i32
    %c0_i32_0 = arith.constant 0 : i32
    %c0_i32_1 = arith.constant 0 : i32
    return %c0_i32, %c0_i32_0 : i32, i32
  }
  func.func @transform_3(%arg0: i32) -> (i32, i32, i32) {
    %c0_i32 = arith.constant 0 : i32
    %c0_i32_0 = arith.constant 0 : i32
    %c0_i32_1 = arith.constant 0 : i32
    return %arg0, %c0_i32, %c0_i32_0 : i32, i32, i32
  }
}

</mosaic_0001>

<bundles_post_ra>
// kernel: tpu_custom_call.1
= control target key start
LH: loop header
LB: loop body
LE: loop exit
PB: predicated region body
PF: predicated region fallthrough
CT: control target
= control target key end

     0   :  { %8 = vsyncpa [#allocation3], 0  ;;  %s998_s0 = inlined_call_operand.hbm [shape: f32[2,32,256], index: 0, kind: input, shape index: {}]   ;;  %s999_s1 = inlined_call_operand.vmem [shape: f32[8,32], index: 1, kind: input, shape index: {}]   ;;  %s1000_s2 = inlined_call_operand.vmem [shape: f32[32,8], index: 2, kind: input, shape index: {}]   ;;  %s1001_s3 = inlined_call_operand.hbm [shape: f32[2,32,256], index: 3, kind: output, shape index: {}]  }
   0x1   :  { %10 = vsyncpa [#allocation3 + $0x1], 0 }
   0x2   :  { %11 = vsyncpa [#allocation4], 0 }
   0x3   :  { %13 = vsyncpa [#allocation4 + $0x1], 0  ;;  %s780_s12 = smov 0   ;;  %s782_s13 = smov 0  }
   0x4   :  { %s784_s14 = smov 0   ;;  %s786_s15 = smov 0  }
   0x5 LB: > { %s801_s16 = sadd.s32 4294967295, %s749_s15   ;;  %s541_s17 = sadd.s32 4294967294, %s749_s15   ;;  %s749_s15 = sphi %s786_s15, %s1014_s15   ;;  %s745_s14 = sphi %s784_s14, %s1013_s14   ;;  %s741_s13 = sphi %s782_s13, %s1012_s13   ;;  %s737_s12 = sphi %s780_s12, %s1011_s12  }
   0x6   : > { %s805_s18 = sadd.s32 1, %s749_s15   ;;  %s26_s19 = sadd.s32 1, %s745_s14 }
   0x7   : > { %s23_s20 = ssub.s32 %s749_s15, %s805_s18  ;;  %p33_p0 = scmp.ne.s32.totalorder %s745_s14, %s741_s13 }
   0x8   : > { %p24_p1 = scmp.eq.s32.totalorder %s23_s20, 0  ;;  %p34_p2 = scmp.eq.s32.totalorder %s749_s15, 0 }
   0x9   : > { %p39_p3 = scmp.ne.s32.totalorder %s741_s13, %s737_s12  ;;  %p40_p4 = scmp.eq.s32.totalorder %s801_s16, 0 }
   0xa   : > { %s817_s21 = scalar_select %p24_p1, %s745_s14, %s26_s19  }
   0xb   : > { %p819_p5 = por %p34_p2, %p33_p0  ;;  %p823_p6 = por %p40_p4, %p39_p3 }
   0xc   : > { %p105_p7 = scmp.eq.s32.totalorder %s801_s16, 1  ;;  %p111_p8 = scmp.eq.s32.totalorder %s541_s17, 1 }
   0xd   : > { %p608_p10 = scmp.lt.s32.totalorder %s749_s15, 2  ;;  %s137_s26 = sand.u32 1, %s745_s14  }
   0xe   : > { %p830_p11 = por %p105_p7, %p33_p0  ;;  %p834_p12 = por %p111_p8, %p39_p3 }
   0xf   : > { %s563_s27 = sshll.u32 %s749_s15, 10  ;;  %s544_s28 = sshll.u32 %s137_s26, 6 }
  0x10   : > { %s1005_s24 = scalar_select %p830_p11, 1, 0 }
  0x11   : > { %s1006_s25 = scalar_select %p834_p12, 1, 0 }
  0x12   : > { %s843_s4 = scalar_lea.hbm %s998_s0, %s563_s27  ;;  %s141_s5 = scalar_lea.vmem [#allocation2], %s544_s28 }
  0x13   : > { %s148_s6 = sshll.u32 %s141_s5, 4  ;;  %p847_p13 = pnand %p608_p10, %p819_p5  ;;  %s851_s6 = int_to_ptr.vmem [resolvable:$true] %s148_s6 }
  0x14   : > { %s853_s8 = scalar_lea.sflag [#allocation3], %s137_s26  ;;  %s653_s9 = scalar_lea.hbm %s843_s4, 1024 }
  0x15   : > { %p654_p0 = scmp.ne.s32.totalorder %s843_s4, %s653_s9  ;;  %p655_p1 = pneg %p847_p13 }
  0x16   : > { %s658_s17 = scalar_lea.hbm %s998_s0, 2048  ;;  %p659_p4 = scmp.lt.u32.totalorder %s843_s4, %s998_s0 }
  0x17   : > { %p656_p2 = pnand %p655_p1, %p654_p0  ;;  %p660_p5 = scmp.lt.u32.totalorder %s658_s17, %s653_s9 }
  0x18   : > { %p662_p8 = scmp.lt.u32.totalorder %s653_s9, %s843_s4 }
  0x19   : > { %p657_p3 = pneg %p656_p2  ;;  %p661_p7 = por %p660_p5, %p659_p4 }
  0x1b   : > { %p663_p10 = por %p662_p8, %p661_p7 }
  0x1d   : > { %p664_p9 = pnand %p663_p10, %p657_p3 }
  0x1f   : > { %667 = shalt.err (!%p664_p9)
}
  0x20   : > { %s668_s22 = scalar_lea.vmem %s851_s6, 1024  ;;  %s751_s26 = smov [#allocation2]  }
  0x21   : > { %p669_p0 = scmp.ne.s32.totalorder %s851_s6, %s668_s22  ;;  %s673_s27 = sshll.u32 %s751_s26, 4  ;;  %s674_s27 = int_to_ptr.vmem [resolvable:$false] %s673_s27 }
  0x22   : > { %s675_s28 = scalar_lea.vmem %s674_s27, 2048  ;;  %p676_p11 = scmp.lt.s32.totalorder %s851_s6, %s674_s27 }
  0x23   : > { %p671_p2 = pnand %p669_p0, %p655_p1  ;;  %p677_p4 = scmp.lt.s32.totalorder %s675_s28, %s668_s22 }
  0x25   : > { %p672_p12 = pneg %p671_p2  ;;  %p678_p5 = por %p677_p4, %p676_p11 }
  0x27   : > { %p679_p7 = pnand %p678_p5, %p672_p12 }
  0x29   : > { %682 = shalt.err (!%p679_p7)
}
  0x2a   : > { %s752_s29 = smov 256   ;;  %s753_s30 = smov 16  }
  0x2b   : > { %603 = dma.hbm_to_vmem [thread:$0]  (!%p847_p13), %s843_s4, 1024, %s851_s6, %s853_s8, %s752_s29, %s752_s29, %s753_s30  }
  0x2c   : > { %p547_p9 = scmp.ge.s32.totalorder %s749_s15, 1  ;;  %p156_p1 = scmp.lt.s32.totalorder %s749_s15, 3 }
  0x2e   : > { %p157_p3 = pnand %p547_p9, %p156_p1 }
  0x2f   : > { %s884_s5 = sand.u32 (!%p157_p3), 1, %s741_s13  }
  0x30   : > { %160 = sbr.rel (%p157_p3) target bundleno = 808 (0x328), region = 32  ;;  %s548_s9 = sshll.u32 (!%p157_p3), %s884_s5, 6 }
  0x31   : > { %s163_s10 = scalar_lea.sflag (!%p157_p3), [#allocation3], %s884_s5  ;;  %s166_s11 = scalar_lea.vmem (!%p157_p3), [#allocation2], %s548_s9 }
  0x37   : > { %728 = dma.done.wait (%p823_p6), %s163_s10, 1024  }
  0x38   : > { %730 = vsyncadd (%p823_p6), %s163_s10, 4294966272  ;;  %v894_v0 = vld [vmem:[%s166_s11] sm:$0xff]  ;;  %v896_v1 = vld [vmem:[%s166_s11 + $0x8] sm:$0xff]  ;;  %v754_v12 = vmov 0.0   ;;  %vm249_vm0 = vcmask 261120   ;;  %vm755_vm1 = vmmov 0   ;;  %v222_v21 = vlaneseq }
  0x39   : > { %v898_v2 = vld [vmem:[%s166_s11 + $0x20] sm:$0xff]  ;;  %v197_v3 = vadd.f32 %v896_v1, %v894_v0  ;;  %v902_v4 = vld [vmem:[%s166_s11 + $0x28] sm:$0xff]  ;;  %v904_v5 = vld [vmem:[%s166_s11 + $0x10] sm:$0xff]  ;;  %572 = vmatprep.subr.mxu0 %v754_v12  ;;  %574 = vmatprep.mubr.msk.f32.mxu0 %vm755_vm1, %v754_v12  ;;  %vm327_vm2 = vcmask 64512   ;;  %v756_v16 = vmov 0.0|0.0   ;;  %vm233_vm4 = vcmask 130112  }
  0x3a   : > { %v906_v6 = vld [vmem:[%s166_s11 + $0x18] sm:$0xff]  ;;  %v203_v7 = vadd.f32 %v902_v4, %v898_v2  ;;  %v910_v8 = vld [vmem:[%s166_s11 + $0x30] sm:$0xff]  ;;  %v213_v13 = vld [vmem:[%s999_s1] sm:$0xff]  ;;  %585 = vmatprep.mubr.msk.f32.mxu1 %vm755_vm1, %v754_v12  ;;  %588 = vmatprep.subr.bf16.mxu1 %v756_v16  ;;  %v223_v22 = vand.u32 127, %v222_v21  ;;  %v225_v23 = vshrl.u32 %v222_v21, 7  ;;  %vm240_vm5 = vcmask 195712  }
  0x3b   : > { %v912_v9 = vld [vmem:[%s166_s11 + $0x38] sm:$0xff]  ;;  %198 = vadd.xlane.f32.xlu0 %v197_v3  ;;  %v200_v10 = vadd.f32 %v906_v6, %v904_v5  ;;  %573 = vmatpush3.xpose.msk.msra.mxu0 %vm249_vm0, %v213_v13  ;;  %v214_v14 = vld [vmem:[%s1000_s2] sm:$0xff]  ;;  %v215_v15 = vld [vmem:[%s1000_s2 + $0x8] sm:$0xff]  ;;  %vm247_vm6 = vcmask 261312   ;;  %s188_s27 = scalar_lea.vmem [#allocation5], %s548_s9  ;;  %s564_s29 = sshll.u32 %s801_s16, 10 }
  0x3c   : > { %204 = vadd.xlane.f32.xlu1 %v203_v7  ;;  %v206_v11 = vadd.f32 %v912_v9, %v910_v8  ;;  %v589_v17 = vpack.c.bf16 %v215_v15, %v214_v14  ;;  %vm590_vm3 = vmpackc.low %vm327_vm2, %vm327_vm2  ;;  %v216_v18 = vld [vmem:[%s1000_s2 + $0x10] sm:$0xff]  ;;  %v217_v19 = vld [vmem:[%s1000_s2 + $0x18] sm:$0xff]  ;;  %v228_v24 = vadd.s32 4294967288, %v223_v22  ;;  %v235_v26 = vadd.s32 4294967280, %v223_v22  ;;  %s468_s28 = sshll.u32 %s188_s27, 4  ;;  %s952_s10 = scalar_lea.hbm %s1001_s3, %s564_s29  ;;  %s947_s28 = int_to_ptr.vmem [resolvable:$true] %s468_s28 }
  0x3d   : > { %v593_v20 = vpack.c.bf16 %v217_v19, %v216_v18  ;;  %v242_v27 = vadd.s32 4294967272, %v223_v22  ;;  %v226_v29 = vsub.s32 %v223_v22, %v225_v23  ;;  %v421_v55 = vsub.s32 0, %v225_v23  ;;  %s455_s16 = scalar_lea.sflag [#allocation4], %s884_s5  ;;  %s683_s11 = scalar_lea.vmem %s947_s28, 1024 }
  0x3e   : > { %591 = vmatpush3.bf16.xpose.msk.msra.mxu1 %vm590_vm3, %v589_v17  ;;  %v231_v31 = vsub.s32 %v228_v24, %v225_v23  ;;  %v238_v32 = vsub.s32 %v235_v26, %v225_v23  ;;  %p684_p6 = scmp.ne.s32.totalorder %s947_s28, %s683_s11  ;;  %p1008_p11 = scmp.ne.s32.totalorder %s1005_s24, 0 }
  0x3f   : > { %201 = vadd.xlane.f32.xlu0 %v200_v10  ;;  %592 = vmatprep.subr.bf16.mxu1 %v756_v16  ;;  %v245_v35 = vsub.s32 %v242_v27, %v225_v23  ;;  %s757_s23 = smov [#allocation5]  }
  0x40   : > { %207 = vadd.xlane.f32.xlu1 %v206_v11  ;;  %p685_p12 = pnand %p684_p6, %p1008_p11  ;;  %s687_s4 = sshll.u32 %s757_s23, 4  ;;  %s688_s4 = int_to_ptr.vmem [resolvable:$false] %s687_s4 }
  0x41   : > { %s689_s6 = scalar_lea.vmem %s688_s4, 2048  ;;  %p690_p8 = scmp.lt.s32.totalorder %s947_s28, %s688_s4 }
  0x42   : > { %p686_p13 = pneg %p685_p12  ;;  %p691_p10 = scmp.lt.s32.totalorder %s689_s6, %s683_s11 }
  0x44   : > { %p692_p0 = por %p691_p10, %p690_p8 }
  0x46   : > { %595 = vmatpush3.bf16.xpose.msk.msra.mxu1 %vm590_vm3, %v593_v20  ;;  %p693_p2 = pnand %p692_p0, %p686_p13 }
  0xc8   : > { %v199_v25 = vpop.xlane.xlu0 %198 }
  0xc9   : > { %v205_v28 = vpop.xlane.xlu1 %204  ;;  %v209_v30 = vmul.f32 0.00390625, %v199_v25 }
  0xca   : > { %v211_v33 = vmul.f32 0.00390625, %v205_v28 }
  0xcb   : > { %v227_v39 = vrot.slane %v209_v30, %v226_v29 }
  0xcc   : > { %v202_v34 = vpop.xlane.xlu0 %201  ;;  %v239_v41 = vrot.slane %v211_v33, %v238_v32 }
  0xcd   : > { %v210_v36 = vmul.f32 0.00390625, %v202_v34  ;;  %v208_v37 = vpop.xlane.xlu1 %207 }
  0xce   : > { %v212_v38 = vmul.f32 0.00390625, %v208_v37 }
  0xcf   : > { %v232_v40 = vrot.slane %v210_v36, %v231_v31 }
  0xd0   : > { %v246_v42 = vrot.slane %v212_v38, %v245_v35 }
  0xd1   : > { %v234_v43 = vsel %vm233_vm4, %v232_v40, %v227_v39 }
  0xd2   : > { %v241_v44 = vsel %vm240_vm5, %v239_v41, %v234_v43 }
  0xd3   : > { %v248_v45 = vsel %vm247_vm6, %v246_v42, %v241_v44 }
  0xd4   : > { %575 = vmatmul.mubr.msk.f32.vlgmr.msra.gmra.mrb[0].mxu0 %vm249_vm0, %v248_v45 }
 0x1a7   : > { %v321_v46 = vpop.f32.mrb[0].mxu0 }
 0x1a8   : > { %v325_v47 = vmax.f32 %v321_v46, 0.0  ;;  %v576_v48 = vpop.f32.mrb[1].mxu0 }
 0x1aa   : > { %v326_v49 = vmin.f32 %v325_v47, 6.0 }
 0x1ac   : > { %586 = vmatmul.mubr.msk.f32.vlgmr.msra.gmra.mrb[0].mxu1 %vm327_vm2, %v326_v49 }
 0x27f   : > { %v409_v50 = vpop.f32.mrb[0].mxu1 }
 0x280   : > { %v557_v51 = vmul.f32 -1.442695, %v409_v50  ;;  %v587_v52 = vpop.f32.mrb[1].mxu1 }
 0x282   : > { %649 = vpow2.f32 %v557_v51 }
 0x28c   : > { %v650_v53 = vpop.eup %649 }
 0x28d   : > { %v416_v54 = vadd.f32 1.0, %v650_v53 }
 0x28f   : > { %651 = vrcp.f32 %v416_v54 }
 0x299   : > { %v652_v56 = vpop.eup %651 }
 0x29a   : > { %v422_v57 = vrot.slane %v652_v56, %v421_v55 }
 0x29c   : > { %428 = vbcast.lane.b32.xlu1 %v422_v57, 264  ;;  %424 = vbcast.lane.b32.xlu0 %v422_v57, 256 }
 0x2a0   : > { %432 = vbcast.lane.b32.xlu1 %v422_v57, 272 }
 0x2a4   : > { %436 = vbcast.lane.b32.xlu1 %v422_v57, 280 }
 0x30e   : > { %v429_v58 = vpop.permute.xlu1 %428  ;;  %v425_v59 = vpop.permute.xlu0 %424 }
 0x30f   : > { %v440_v60 = vmul.f32 %v429_v58, %v904_v5  ;;  %v441_v61 = vmul.f32 %v429_v58, %v906_v6  ;;  %v438_v62 = vmul.f32 %v425_v59, %v894_v0  ;;  %v439_v63 = vmul.f32 %v425_v59, %v896_v1 }
 0x311   : > { %448 = vst [vmem:[%s188_s27 + $0x10] sm:$0xff] %v440_v60  ;;  %449 = vst [vmem:[%s188_s27 + $0x18] sm:$0xff] %v441_v61 }
 0x312   : > { %446 = vst [vmem:[%s188_s27] sm:$0xff] %v438_v62  ;;  %447 = vst [vmem:[%s188_s27 + $0x8] sm:$0xff] %v439_v63  ;;  %v433_v3 = vpop.permute.xlu1 %432 }
 0x313   : > { %v442_v7 = vmul.f32 %v433_v3, %v898_v2  ;;  %v443_v5 = vmul.f32 %v433_v3, %v902_v4 }
 0x315   : > { %450 = vst [vmem:[%s188_s27 + $0x20] sm:$0xff] %v442_v7  ;;  %451 = vst [vmem:[%s188_s27 + $0x28] sm:$0xff] %v443_v5 }
 0x316   : > { %v437_v0 = vpop.permute.xlu1 %436 }
 0x317   : > { %v444_v1 = vmul.f32 %v437_v0, %v910_v8  ;;  %v445_v2 = vmul.f32 %v437_v0, %v912_v9 }
 0x319   : > { %452 = vst [vmem:[%s188_s27 + $0x30] sm:$0xff] %v444_v1  ;;  %453 = vst [vmem:[%s188_s27 + $0x38] sm:$0xff] %v445_v2 }
 0x31a   : > { %696 = shalt.err (!%p693_p2)
}
 0x31b   : > { %s697_s7 = scalar_lea.hbm %s952_s10, 1024  ;;  %s701_s19 = scalar_lea.hbm %s1001_s3, 2048 }
 0x31c   : > { %p698_p4 = scmp.ne.s32.totalorder %s952_s10, %s697_s7  ;;  %p702_p9 = scmp.lt.u32.totalorder %s952_s10, %s1001_s3 }
 0x31d   : > { %p703_p1 = scmp.lt.u32.totalorder %s701_s19, %s697_s7  ;;  %p705_p6 = scmp.lt.u32.totalorder %s697_s7, %s952_s10 }
 0x31e   : > { %p699_p5 = pnand %p698_p4, %p1008_p11 }
 0x31f   : > { %p704_p3 = por %p703_p1, %p702_p9 }
 0x320   : > { %p700_p7 = pneg %p699_p5 }
 0x321   : > { %p706_p12 = por %p705_p6, %p704_p3 }
 0x323   : > { %p707_p13 = pnand %p706_p12, %p700_p7 }
 0x325   : > { %710 = shalt.err (!%p707_p13)
}
 0x326   : > { %s758_s26 = smov 256   ;;  %s759_s27 = smov 16  }
 0x327   : > { %598 = dma.vmem_to_hbm [thread:$0]  (%p1008_p11), %s947_s28, 1024, %s952_s10, %s455_s16, %s758_s26, %s758_s26, %s759_s27  }
 0x328 PF: > { %s483_s29 = sand.u32 1, %s737_s12   ;;  %p1009_p8 = scmp.ne.s32.totalorder %s1006_s25, 0 }
 0x329   : > { %p1010_p10 = scmp.ge.s32.totalorder %s749_s15, 2  ;;  %s484_s30 = scalar_lea.sflag [#allocation4], %s483_s29 }
 0x32b   : > { %p605_p0 = pnand %p1010_p10, %p1009_p8 }
 0x32d   : > { %732 = dma.done.wait (!%p605_p0), %s484_s30, 1024  }
 0x32e   : > { %734 = vsyncadd (!%p605_p0), %s484_s30, 4294966272  ;;  %p16_p2 = scmp.ge.s32.totalorder %s805_s18, 4   ;;  %s1011_s12 = smov %s741_s13 }
 0x32f   : > { %s1012_s13 = smov %s745_s14  ;;  %s1013_s14 = smov %s817_s21 }
 0x330   : > { %s1014_s15 = smov %s805_s18  ;;  %18 = sbr.rel (!%p16_p2) target bundleno = 5 (0x5), region = 77 }
 0x337   :  { %489 = vsyncpa [#allocation3], 1 }
 0x338   :  { %491 = vsyncpa [#allocation3 + $0x1], 1 }
 0x339   :  { %492 = vsyncpa [#allocation4], 1 }
 0x33a   :  { %494 = vsyncpa [#allocation4 + $0x1], 1 }

</bundles_post_ra>
